<compile_context>
chip_gen: v6e
topology: v6e:2x2x1
jax: 0.10.0
libtpu: 0.0.40
codegen_flags: <defaults>
</compile_context>

<pallas_src>
import jax
import jax.numpy as jnp
from jax.experimental import pallas as pl
from jax.experimental.pallas import tpu as pltpu


def _round_up(n, m):
    return ((n + m - 1) // m) * m


def init_params(key, input_dim, output_dim):
    """PyTorch nn.Linear-style init; weights stored as (in, out)."""
    dims = [(input_dim, 64), (64, 32), (32, 16), (16, output_dim)]
    params = {}
    for i, (fan_in, fan_out) in enumerate(dims, start=1):
        key, kw, kb = jax.random.split(key, 3)
        bound = 1.0 / jnp.sqrt(jnp.float32(fan_in))
        params[f"w{i}"] = jax.random.uniform(
            kw, (fan_in, fan_out), jnp.float32, -bound, bound)
        params[f"b{i}"] = jax.random.uniform(
            kb, (1, fan_out), jnp.float32, -bound, bound)
    return params


def pack_params(params, output_dim, weight_dtype=jnp.float32):
    """Feature-major packing.

    Returns (w1, b1, w2, b2, w34, b34) with weights as (d_out, d_in) and
    biases as (d_out, 1).  Linear3 and Linear4 are fused exactly (no
    activation between them); the fused output dim is zero-padded to a
    multiple of 8 sublanes.
    """
    # Exact fusion: h @ w3 @ w4 + (b3 @ w4 + b4)
    w34 = params["w3"] @ params["w4"]                  # (32, out)
    b34 = params["b3"] @ params["w4"] + params["b4"]   # (1, out)

    d_out_p = max(8, _round_up(output_dim, 8))

    w1 = params["w1"].T.astype(weight_dtype)           # (64, d_in)
    w2 = params["w2"].T.astype(weight_dtype)           # (32, 64)
    w3p = jnp.zeros((d_out_p, 32), weight_dtype)
    w3p = w3p.at[:output_dim, :].set(w34.T.astype(weight_dtype))

    b1 = params["b1"].T.astype(jnp.float32)            # (64, 1)
    b2 = params["b2"].T.astype(jnp.float32)            # (32, 1)
    b3p = jnp.zeros((d_out_p, 1), jnp.float32)
    b3p = b3p.at[:output_dim, :].set(b34.T.astype(jnp.float32))

    return (w1, b1, w2, b2, w3p, b3p)


def _mlp_kernel(x_ref, w1_ref, b1_ref, w2_ref, b2_ref, w3_ref, b3_ref, o_ref):
    cdt = w1_ref.dtype  # compute dtype for MXU operands (f32 or bf16)

    # Layer 1: (64, d_in) @ (d_in, tb) -> (64, tb), ReLU
    h = jnp.dot(w1_ref[...], x_ref[...].astype(cdt),
                preferred_element_type=jnp.float32) + b1_ref[...]
    h = jnp.maximum(h, 0.0)

    # Layer 2: (32, 64) @ (64, tb) -> (32, tb), ReLU
    h = jnp.dot(w2_ref[...], h.astype(cdt),
                preferred_element_type=jnp.float32) + b2_ref[...]
    h = jnp.maximum(h, 0.0)

    # Fused layers 3+4: (d_out_p, 32) @ (32, tb) -> (d_out_p, tb)
    h = jnp.dot(w3_ref[...], h.astype(cdt),
                preferred_element_type=jnp.float32) + b3_ref[...]

    # sigmoid(z) = 1 / (1 + exp(-z)); exp + approx reciprocal live on the EUP.
    # Lane-dense (d_out_p, tb) store -> unmasked vst.
    o_ref[...] = pl.reciprocal(1.0 + jnp.exp(-h), approx=True).astype(o_ref.dtype)


def mymodel_forward(x, packed, output_dim, *, block_batch=8192):
    """x: (batch, d_in) f32; packed: output of pack_params()."""
    w1, b1, w2, b2, w3, b3 = packed
    batch, d_in = x.shape
    d_out_p = w3.shape[0]

    # Batch tile on the lane axis: multiple of 128, capped so the grid keeps
    # >= 2 steps when the batch spans >= 2 lane tiles (v7x has 2 TensorCores
    # sharing the "parallel" batch axis).
    tb = max(128, _round_up(min(block_batch, batch), 128))
    padded_min = _round_up(batch, 128)
    if padded_min >= 256:
        tb = min(tb, _round_up(padded_min // 2, 128))
    tb = min(tb, padded_min)
    padded = _round_up(batch, tb)
    grid = (padded // tb,)

    # Transpose once (feature-major), stream x in the weights' dtype
    # (bf16 halves x HBM traffic; matmuls still accumulate in f32).
    xt = x.T.astype(w1.dtype)                          # (d_in, batch)
    if padded != batch:
        xt = jnp.pad(xt, ((0, 0), (0, padded - batch)))

    itemsize = jnp.dtype(w1.dtype).itemsize
    flops = 2 * padded * (64 * d_in + 32 * 64 + d_out_p * 32)
    bytes_accessed = (padded * d_in * itemsize            # streamed x
                      + padded * d_out_p * 4              # output
                      + sum(int(a.size) * jnp.dtype(a.dtype).itemsize
                            for a in packed))             # resident params
    cost = pl.CostEstimate(flops=flops,
                           transcendentals=padded * d_out_p,
                           bytes_accessed=bytes_accessed)

    const = lambda i: (0, 0)  # VMEM-resident operands (DMA'd once)

    out = pl.pallas_call(
        _mlp_kernel,
        out_shape=jax.ShapeDtypeStruct((d_out_p, padded), jnp.float32),
        grid_spec=pltpu.PrefetchScalarGridSpec(
            num_scalar_prefetch=0,
            grid=grid,
            in_specs=[
                pl.BlockSpec((d_in, tb), lambda i: (0, i)),      # streamed x tile
                pl.BlockSpec(w1.shape, const),
                pl.BlockSpec(b1.shape, const),
                pl.BlockSpec(w2.shape, const),
                pl.BlockSpec(b2.shape, const),
                pl.BlockSpec(w3.shape, const),
                pl.BlockSpec(b3.shape, const),
            ],
            out_specs=pl.BlockSpec((d_out_p, tb), lambda i: (0, i)),
        ),
        compiler_params=pltpu.CompilerParams(
            dimension_semantics=("parallel",),
            vmem_limit_bytes=32 * 1024 * 1024,
        ),
        cost_estimate=cost,
    )(xt, w1, b1, w2, b2, w3, b3)

    # Drop padded output rows / padded batch columns, back to (batch, out).
    return out[:output_dim, :batch].T


def reference_forward(x, params):
    h = jnp.maximum(x @ params["w1"] + params["b1"], 0.0)
    h = jnp.maximum(h @ params["w2"] + params["b2"], 0.0)
    h = h @ params["w3"] + params["b3"]
    z = h @ params["w4"] + params["b4"]
    return jax.nn.sigmoid(z)


if __name__ == "__main__":
    input_dim = 8     # Titanic-style feature count
    output_dim = 1    # survival probability
    batch = 200       # not a tile multiple -> exercises padding; 2-step grid

    key = jax.random.PRNGKey(0)
    kx, kp = jax.random.split(key)
    x = jax.random.normal(kx, (batch, input_dim), dtype=jnp.float32)
    params = init_params(kp, input_dim, output_dim)
    ref = reference_forward(x, params)

    # f32 path (safe everywhere incl. v5e VPU/EUP; tight tolerance).
    packed_f32 = pack_params(params, output_dim, weight_dtype=jnp.float32)
    out = jax.block_until_ready(mymodel_forward(x, packed_f32, output_dim))
    assert out.shape == (batch, output_dim)
    # approx=True reciprocal -> slightly relaxed tolerance vs f32 reference.
    assert jnp.allclose(out, ref, atol=3e-3), "f32 path mismatch vs JAX reference"

    # bf16 streaming path (halves x HBM traffic; v6e/v7x native bf16 MXU,
    # v5e MXU handles bf16 operands too). Activations are downcast to bf16
    # before each matmul -> relaxed tolerance.
    packed_bf16 = pack_params(params, output_dim, weight_dtype=jnp.bfloat16)
    out_bf16 = jax.block_until_ready(mymodel_forward(x, packed_bf16, output_dim))
    assert out_bf16.shape == (batch, output_dim)
    assert jnp.allclose(out_bf16, ref, atol=3e-2), "bf16 path mismatch vs JAX reference"

    print("KERNEL_OK")
</pallas_src>

<mosaic_0001>
module attributes {stable_mosaic.version = 11 : i64} {
  func.func @_mlp_kernel(%arg0: i32, %arg1: memref<8x128xf32, #tpu.memory_space<vmem>>, %arg2: memref<64x8xf32, #tpu.memory_space<vmem>>, %arg3: memref<64x1xf32, #tpu.memory_space<vmem>>, %arg4: memref<32x64xf32, #tpu.memory_space<vmem>>, %arg5: memref<32x1xf32, #tpu.memory_space<vmem>>, %arg6: memref<8x32xf32, #tpu.memory_space<vmem>>, %arg7: memref<8x1xf32, #tpu.memory_space<vmem>>, %arg8: memref<8x128xf32, #tpu.memory_space<vmem>>) attributes {dimension_semantics = [#tpu.dimension_semantics<parallel>], iteration_bounds = array<i64: 2>, scalar_prefetch = 0 : i64, scratch_operands = 0 : i64, tpu.core_type = #tpu.core_type<tc>, window_params = [{transform_indices = @transform_0, window_bounds = array<i64: 8, 128>}, {pipeline_mode = #tpu.pipeline_mode<synchronous>, transform_indices = @transform_1, window_bounds = array<i64: 64, 8>}, {pipeline_mode = #tpu.pipeline_mode<synchronous>, transform_indices = @transform_2, window_bounds = array<i64: 64, 1>}, {pipeline_mode = #tpu.pipeline_mode<synchronous>, transform_indices = @transform_3, window_bounds = array<i64: 32, 64>}, {pipeline_mode = #tpu.pipeline_mode<synchronous>, transform_indices = @transform_4, window_bounds = array<i64: 32, 1>}, {pipeline_mode = #tpu.pipeline_mode<synchronous>, transform_indices = @transform_5, window_bounds = array<i64: 8, 32>}, {pipeline_mode = #tpu.pipeline_mode<synchronous>, transform_indices = @transform_6, window_bounds = array<i64: 8, 1>}, {transform_indices = @transform_7, window_bounds = array<i64: 8, 128>}]} {
    %c0 = arith.constant 0 : index
    %c0_0 = arith.constant 0 : index
    %0 = vector.load %arg2[%c0, %c0_0] : memref<64x8xf32, #tpu.memory_space<vmem>>, vector<64x8xf32>
    %c0_1 = arith.constant 0 : index
    %c0_2 = arith.constant 0 : index
    %1 = vector.load %arg1[%c0_1, %c0_2] : memref<8x128xf32, #tpu.memory_space<vmem>>, vector<8x128xf32>
    %cst = arith.constant dense<0.000000e+00> : vector<64x128xf32>
    %2 = tpu.matmul %0, %1, %cst {dimension_numbers = #tpu.dot_dimension_numbers<[1], [0], [0], [1], [0, 0, 1, 1], [], []>} : vector<64x8xf32>, vector<8x128xf32>, vector<64x128xf32> -> vector<64x128xf32>
    %c0_3 = arith.constant 0 : index
    %c0_4 = arith.constant 0 : index
    %3 = vector.load %arg3[%c0_3, %c0_4] : memref<64x1xf32, #tpu.memory_space<vmem>>, vector<64x1xf32>
    %4 = vector.broadcast %3 : vector<64x1xf32> to vector<64x128xf32>
    %5 = arith.addf %2, %4 : vector<64x128xf32>
    %cst_5 = arith.constant 0.000000e+00 : f32
    %6 = vector.broadcast %cst_5 : f32 to vector<64x128xf32>
    %7 = arith.maximumf %5, %6 : vector<64x128xf32>
    %c0_6 = arith.constant 0 : index
    %c0_7 = arith.constant 0 : index
    %8 = vector.load %arg4[%c0_6, %c0_7] : memref<32x64xf32, #tpu.memory_space<vmem>>, vector<32x64xf32>
    %cst_8 = arith.constant dense<0.000000e+00> : vector<32x128xf32>
    %9 = tpu.matmul %8, %7, %cst_8 {dimension_numbers = #tpu.dot_dimension_numbers<[1], [0], [0], [1], [0, 0, 1, 1], [], []>} : vector<32x64xf32>, vector<64x128xf32>, vector<32x128xf32> -> vector<32x128xf32>
    %c0_9 = arith.constant 0 : index
    %c0_10 = arith.constant 0 : index
    %10 = vector.load %arg5[%c0_9, %c0_10] : memref<32x1xf32, #tpu.memory_space<vmem>>, vector<32x1xf32>
    %11 = vector.broadcast %10 : vector<32x1xf32> to vector<32x128xf32>
    %12 = arith.addf %9, %11 : vector<32x128xf32>
    %cst_11 = arith.constant 0.000000e+00 : f32
    %13 = vector.broadcast %cst_11 : f32 to vector<32x128xf32>
    %14 = arith.maximumf %12, %13 : vector<32x128xf32>
    %c0_12 = arith.constant 0 : index
    %c0_13 = arith.constant 0 : index
    %15 = vector.load %arg6[%c0_12, %c0_13] : memref<8x32xf32, #tpu.memory_space<vmem>>, vector<8x32xf32>
    %cst_14 = arith.constant dense<0.000000e+00> : vector<8x128xf32>
    %16 = tpu.matmul %15, %14, %cst_14 {dimension_numbers = #tpu.dot_dimension_numbers<[1], [0], [0], [1], [0, 0, 1, 1], [], []>} : vector<8x32xf32>, vector<32x128xf32>, vector<8x128xf32> -> vector<8x128xf32>
    %c0_15 = arith.constant 0 : index
    %c0_16 = arith.constant 0 : index
    %17 = vector.load %arg7[%c0_15, %c0_16] : memref<8x1xf32, #tpu.memory_space<vmem>>, vector<8x1xf32>
    %18 = vector.broadcast %17 : vector<8x1xf32> to vector<8x128xf32>
    %19 = arith.addf %16, %18 : vector<8x128xf32>
    %cst_17 = arith.constant 0.000000e+00 : f32
    %20 = vector.broadcast %cst_17 : f32 to vector<8x128xf32>
    %21 = arith.subf %20, %19 : vector<8x128xf32>
    %22 = math.exp %21 : vector<8x128xf32>
    %cst_18 = arith.constant 1.000000e+00 : f32
    %23 = vector.broadcast %cst_18 : f32 to vector<8x128xf32>
    %24 = arith.addf %23, %22 : vector<8x128xf32>
    %25 = tpu.reciprocal %24 {approx = true} : vector<8x128xf32> -> vector<8x128xf32>
    %c0_19 = arith.constant 0 : index
    %c0_20 = arith.constant 0 : index
    %26 = vector.load %arg8[%c0_19, %c0_20] : memref<8x128xf32, #tpu.memory_space<vmem>>, vector<8x128xf32>
    tpu.vector_store %arg8[%c0_19, %c0_20], %25 {strides = array<i32>} : memref<8x128xf32, #tpu.memory_space<vmem>>, vector<8x128xf32>,
    return
  }
  func.func @transform_0(%arg0: i32) -> (i32, i32) {
    %c0_i32 = arith.constant 0 : i32
    %c0_i32_0 = arith.constant 0 : i32
    return %c0_i32, %arg0 : i32, i32
  }
  func.func @transform_1(%arg0: i32) -> (i32, i32) {
    %c0_i32 = arith.constant 0 : i32
    %c0_i32_0 = arith.constant 0 : i32
    %c0_i32_1 = arith.constant 0 : i32
    return %c0_i32, %c0_i32_0 : i32, i32
  }
  func.func @transform_2(%arg0: i32) -> (i32, i32) {
    %c0_i32 = arith.constant 0 : i32
    %c0_i32_0 = arith.constant 0 : i32
    %c0_i32_1 = arith.constant 0 : i32
    return %c0_i32, %c0_i32_0 : i32, i32
  }
  func.func @transform_3(%arg0: i32) -> (i32, i32) {
    %c0_i32 = arith.constant 0 : i32
    %c0_i32_0 = arith.constant 0 : i32
    %c0_i32_1 = arith.constant 0 : i32
    return %c0_i32, %c0_i32_0 : i32, i32
  }
  func.func @transform_4(%arg0: i32) -> (i32, i32) {
    %c0_i32 = arith.constant 0 : i32
    %c0_i32_0 = arith.constant 0 : i32
    %c0_i32_1 = arith.constant 0 : i32
    return %c0_i32, %c0_i32_0 : i32, i32
  }
  func.func @transform_5(%arg0: i32) -> (i32, i32) {
    %c0_i32 = arith.constant 0 : i32
    %c0_i32_0 = arith.constant 0 : i32
    %c0_i32_1 = arith.constant 0 : i32
    return %c0_i32, %c0_i32_0 : i32, i32
  }
  func.func @transform_6(%arg0: i32) -> (i32, i32) {
    %c0_i32 = arith.constant 0 : i32
    %c0_i32_0 = arith.constant 0 : i32
    %c0_i32_1 = arith.constant 0 : i32
    return %c0_i32, %c0_i32_0 : i32, i32
  }
  func.func @transform_7(%arg0: i32) -> (i32, i32) {
    %c0_i32 = arith.constant 0 : i32
    %c0_i32_0 = arith.constant 0 : i32
    return %c0_i32, %arg0 : i32, i32
  }
}

</mosaic_0001>

<bundles_post_ra>
// kernel: tpu_custom_call.1
= control target key start
LH: loop header
LB: loop body
LE: loop exit
PB: predicated region body
PF: predicated region fallthrough
CT: control target
= control target key end

     0   :  { %12 = vsyncpa [#allocation3], 0  ;;  %s1192_s0 = inlined_call_operand.vmem [shape: f32[8,256], index: 0, kind: input, shape index: {}]   ;;  %s1193_s1 = inlined_call_operand.vmem [shape: f32[64,8], index: 1, kind: input, shape index: {}]   ;;  %s1194_s2 = inlined_call_operand.vmem [shape: f32[64,1], index: 2, kind: input, shape index: {}]   ;;  %s1195_s3 = inlined_call_operand.vmem [shape: f32[32,64], index: 3, kind: input, shape index: {}]   ;;  %s1196_s4 = inlined_call_operand.vmem [shape: f32[32,1], index: 4, kind: input, shape index: {}]   ;;  %s1197_s5 = inlined_call_operand.vmem [shape: f32[8,32], index: 5, kind: input, shape index: {}]   ;;  %s1198_s6 = inlined_call_operand.vmem [shape: f32[8,1], index: 6, kind: input, shape index: {}]   ;;  %s1199_s7 = inlined_call_operand.hbm [shape: f32[8,256], index: 7, kind: output, shape index: {}]  }
   0x1   :  { %14 = vsyncpa [#allocation3 + $0x1], 0  ;;  %s1009_s24 = smov 0   ;;  %s1011_s25 = smov 0  }
   0x2   :  { %s1013_s26 = smov 0   ;;  %s1015_s27 = smov 0  }
   0x3 LB: > { %s1030_s28 = sadd.s32 4294967295, %s963_s27   ;;  %s759_s29 = sadd.s32 4294967294, %s963_s27   ;;  %s963_s27 = sphi %s1015_s27, %s1205_s27   ;;  %s959_s26 = sphi %s1013_s26, %s1204_s26   ;;  %s955_s25 = sphi %s1011_s25, %s1203_s25   ;;  %s951_s24 = sphi %s1009_s24, %s1202_s24  }
   0x4   : > { %s1034_s30 = sadd.s32 1, %s963_s27   ;;  %s179_s8 = sadd.s32 1, %s959_s26 }
   0x5   : > { %s176_s9 = ssub.s32 %s963_s27, %s1034_s30  ;;  %p189_p0 = scmp.ne.s32.totalorder %s959_s26, %s955_s25 }
   0x6   : > { %p177_p1 = scmp.eq.s32.totalorder %s176_s9, 0  ;;  %p190_p2 = scmp.eq.s32.totalorder %s1030_s28, 1 }
   0x7   : > { %p195_p3 = scmp.ne.s32.totalorder %s955_s25, %s951_s24  ;;  %p196_p4 = scmp.eq.s32.totalorder %s759_s29, 1 }
   0x8   : > { %s1045_s10 = scalar_select %p177_p1, %s959_s26, %s179_s8  }
   0x9   : > { %p1047_p5 = por %p190_p2, %p189_p0  ;;  %p1051_p6 = por %p196_p4, %p195_p3 }
   0xa   : > { %p762_p7 = scmp.ge.s32.totalorder %s963_s27, 1  ;;  %p239_p8 = scmp.lt.s32.totalorder %s963_s27, 3 }
   0xc   : > { %p240_p9 = pnand %p762_p7, %p239_p8 }
   0xd   : > { %p270_p10 = scmp.lt.s32.totalorder (!%p240_p9), %s1030_s28, 1  ;;  %s267_s14 = sand.u32 (!%p240_p9), 1, %s955_s25  }
   0xe   : > { %243 = sbr.rel (%p240_p9) target bundleno = 701 (0x2bd), region = 48  ;;  %s763_s16 = sshll.u32 (!%p240_p9), %s267_s14, 3 }
   0xf   : > { %s269_s17 = scalar_lea.vmem (!%p240_p9), [#allocation2], %s763_s16  ;;  %s687_s22 = scalar_lea.sflag (!%p240_p9), [#allocation3], %s267_s14 }
  0x10   : > { %s700_s18 = sshll.u32 (!%p240_p9), %s269_s17, 4  ;;  %s968_s29 = smov (!%p240_p9), [#allocation2]   ;;  %s701_s18 = int_to_ptr.vmem [resolvable:$true] %s700_s18 }
  0x11   : > { %s903_s23 = scalar_lea.vmem (!%p240_p9), %s701_s18, 128 }
  0x12   : > { %p904_p11 = scmp.ne.s32.totalorder (!%p240_p9), %s701_s18, %s903_s23 }
  0x13   : > { %v274_v0 = vld [vmem:[%s1193_s1] sm:$0xff]  ;;  %vm331_vm0 = vcmask 64512   ;;  %v965_v1 = vmov 0   ;;  %s271_s15 = scalar_select %p270_p10, %s1030_s28, 1  ;;  %v290_v2 = vld [vmem:[%s1194_s2 + $0x38] sm:$0xff]  ;;  %v288_v3 = vld [vmem:[%s1194_s2 + $0x28] sm:$0xff] }
  0x14   : > { %810 = vmatprep.mubr.msk.f32.mxu0 %vm331_vm0, %v274_v0  ;;  %897 = vset.pattern.permute.xlu0 %v965_v1  ;;  %v289_v4 = vld [vmem:[%s1194_s2 + $0x30] sm:$0xff]  ;;  %v287_v5 = vld [vmem:[%s1194_s2 + $0x20] sm:$0xff]  ;;  %v275_v7 = vld [vmem:[%s1193_s1 + $0x8] sm:$0xff]  ;;  %vm497_vm1 = vcmask 523264   ;;  %v966_v59 = vmov 0.0   ;;  %vm967_vm2 = vmmov 0   ;;  %p905_p12 = pnand %p904_p11, %p1047_p5 }
  0x15   : > { %898 = vset.pattern.permute.xlu1 %v965_v1  ;;  %328 = vperm.xlu0 %897, %v290_v2   ;;  %s764_s20 = sshll.u32 %s271_s15, 3  ;;  %v276_v8 = vld [vmem:[%s1193_s1 + $0x10] sm:$0xff]  ;;  %v286_v9 = vld [vmem:[%s1194_s2 + $0x18] sm:$0xff]  ;;  %v278_v12 = vld [vmem:[%s1193_s1 + $0x20] sm:$0xff]  ;;  %vm606_vm3 = vcmask 261120   ;;  %s779_s15 = sshll.u32 %s1030_s28, 7 }
  0x16   : > { %318 = vperm.xlu1 %898, %v288_v3   ;;  %s273_s8 = scalar_lea.vmem %s1192_s0, %s764_s20  ;;  %v285_v10 = vld [vmem:[%s1194_s2 + $0x10] sm:$0xff]  ;;  %v277_v11 = vld [vmem:[%s1193_s1 + $0x18] sm:$0xff]  ;;  %v284_v13 = vld [vmem:[%s1194_s2 + $0x8] sm:$0xff]  ;;  %s1157_s21 = scalar_lea.hbm %s1199_s7, %s779_s15 }
  0x17   : > { %v282_v6 = vld [vmem:[%s273_s8] sm:$0xff]  ;;  %v279_v15 = vld [vmem:[%s1193_s1 + $0x28] sm:$0xff]  ;;  %v280_v16 = vld [vmem:[%s1193_s1 + $0x30] sm:$0xff]  ;;  %p906_p13 = pneg %p905_p12  ;;  %s907_s8 = sshll.u32 %s968_s29, 4  ;;  %s908_s8 = int_to_ptr.vmem [resolvable:$false] %s907_s8 }
  0x18   : > { %808 = vmatprep.subr.mxu0 %v282_v6  ;;  %v283_v14 = vld [vmem:[%s1194_s2] sm:$0xff]  ;;  %v476_v17 = vld [vmem:[%s1196_s4 + $0x18] sm:$0xff]  ;;  %v475_v18 = vld [vmem:[%s1196_s4 + $0x10] sm:$0xff]  ;;  %s909_s28 = scalar_lea.vmem %s908_s8, 256  ;;  %p910_p0 = scmp.lt.s32.totalorder %s701_s18, %s908_s8 }
  0x19   : > { %323 = vperm.xlu0 %897, %v289_v4   ;;  %809 = vmatpush3.msra.mxu0 %v282_v6  ;;  %v281_v19 = vld [vmem:[%s1193_s1 + $0x38] sm:$0xff]  ;;  %v474_v20 = vld [vmem:[%s1196_s4 + $0x8] sm:$0xff]  ;;  %v473_v21 = vld [vmem:[%s1196_s4] sm:$0xff]  ;;  %p911_p1 = scmp.lt.s32.totalorder %s909_s28, %s903_s23 }
  0x1a   : > { %313 = vperm.xlu1 %898, %v287_v5   ;;  %811 = vmatmul.mubr.msk.f32.vlgmr.msra.gmra.mxu0 %vm331_vm0, %v275_v7  ;;  %v600_v22 = vld [vmem:[%s1198_s6] sm:$0xff]  ;;  %v470_v56 = vld [vmem:[%s1195_s3 + $0x8] sm:$0xff]  ;;  %v471_v57 = vld [vmem:[%s1195_s3 + $0x10] sm:$0xff] }
  0x1b   : > { %813 = vmatprep.mubr.msk.f32.mxu0 %vm331_vm0, %v276_v8  ;;  %v469_v23 = vld [vmem:[%s1195_s3] sm:$0xff]  ;;  %v472_v58 = vld [vmem:[%s1195_s3 + $0x18] sm:$0xff]  ;;  %844 = vmatprep.subr.mxu0 %v966_v59  ;;  %p912_p2 = por %p911_p1, %p910_p0 }
  0x1c   : > { %838 = vmatprep.mubr.msk.f32.mxu1 %vm497_vm1, %v469_v23 }
  0x1d   : > { %308 = vperm.xlu0 %897, %v286_v9   ;;  %p913_p3 = pnand %p912_p2, %p906_p13 }
  0x1e   : > { %303 = vperm.xlu1 %898, %v285_v10   ;;  %814 = vmatmul.mubr.msk.f32.gmra.mxu0 %vm331_vm0, %v277_v11 }
  0x1f   : > { %816 = vmatprep.mubr.msk.f32.mxu0 %vm331_vm0, %v278_v12  ;;  %v599_v12 = vld [vmem:[%s1197_s5] sm:$0xff] }
  0x21   : > { %298 = vperm.xlu0 %897, %v284_v13  }
  0x22   : > { %293 = vperm.xlu1 %898, %v283_v14   ;;  %817 = vmatmul.mubr.msk.f32.gmra.mxu0 %vm331_vm0, %v279_v15 }
  0x23   : > { %819 = vmatprep.mubr.msk.f32.mxu0 %vm331_vm0, %v280_v16 }
  0x25   : > { %494 = vperm.xlu0 %897, %v476_v17  }
  0x26   : > { %489 = vperm.xlu1 %898, %v475_v18   ;;  %820 = vmatmul.mubr.msk.f32.gmra.mxu0 %vm331_vm0, %v281_v19 }
  0x27   : > { %852 = vmatprep.mubr.msk.f32.mxu0 %vm967_vm2, %v966_v59 }
  0x29   : > { %484 = vperm.xlu0 %897, %v474_v20  }
  0x2a   : > { %479 = vperm.xlu1 %898, %v473_v21  }
  0x2d   : > { %603 = vperm.xlu0 %897, %v600_v22  }
  0x90   : > { %v329_v26 = vpop.permute.xlu0 %328 }
  0x91   : > { %v319_v27 = vpop.permute.xlu1 %318 }
  0x94   : > { %v324_v31 = vpop.permute.xlu0 %323 }
  0x95   : > { %v314_v32 = vpop.permute.xlu1 %313 }
  0x98   : > { %v309_v40 = vpop.permute.xlu0 %308 }
  0x99   : > { %v304_v41 = vpop.permute.xlu1 %303 }
  0x9c   : > { %v299_v48 = vpop.permute.xlu0 %298 }
  0x9d   : > { %v294_v49 = vpop.permute.xlu1 %293 }
  0xa0   : > { %v495_v60 = vpop.permute.xlu0 %494 }
  0xa1   : > { %v490_v62 = vpop.permute.xlu1 %489 }
  0xa4   : > { %v485_v2 = vpop.permute.xlu0 %484 }
  0xa5   : > { %v480_v7 = vpop.permute.xlu1 %479 }
  0xa8   : > { %v604_v13 = vpop.permute.xlu0 %603 }
  0xda   : > { %v812_v24 = vpop.f32.mrf.mxu0 }
  0xdb   : > { %v428_v50 = vadd.f32 %v812_v24, %v299_v48 }
  0xdc   : > { %v422_v25 = vpop.f32.mrf.mxu0 }
  0xdd   : > { %v423_v52 = vadd.f32 %v422_v25, %v294_v49  ;;  %v462_v54 = vmax.f32 %v428_v50, 0.0 }
  0xde   : > { %v815_v28 = vpop.f32.mrf.mxu0 }
  0xdf   : > { %v438_v44 = vadd.f32 %v815_v28, %v309_v40  ;;  %v461_v55 = vmax.f32 %v423_v52, 0.0 }
  0xe0   : > { %v432_v29 = vpop.f32.mrf.mxu0 }
  0xe1   : > { %v433_v46 = vadd.f32 %v432_v29, %v304_v41  ;;  %v464_v51 = vmax.f32 %v438_v44, 0.0 }
  0xe2   : > { %v818_v30 = vpop.f32.mrf.mxu0 }
  0xe3   : > { %v448_v37 = vadd.f32 %v818_v30, %v319_v27  ;;  %v463_v53 = vmax.f32 %v433_v46, 0.0 }
  0xe4   : > { %v442_v33 = vpop.f32.mrf.mxu0 }
  0xe5   : > { %v443_v42 = vadd.f32 %v442_v33, %v314_v32  ;;  %v466_v45 = vmax.f32 %v448_v37, 0.0 }
  0xe6   : > { %v821_v34 = vpop.f32.mrf.mxu0 }
  0xe7   : > { %v458_v35 = vadd.f32 %v821_v34, %v329_v26  ;;  %v465_v47 = vmax.f32 %v443_v42, 0.0 }
  0xe8   : > { %v452_v36 = vpop.f32.mrf.mxu0 }
  0xe9   : > { %v468_v38 = vmax.f32 %v458_v35, 0.0  ;;  %v453_v39 = vadd.f32 %v452_v36, %v324_v31 }
  0xeb   : > { %v467_v43 = vmax.f32 %v453_v39, 0.0  ;;  %822 = vmatprep.subr.mxu1 %v468_v38 }
  0xec   : > { %823 = vmatpush3.msra.mxu1 %v468_v38 }
  0xed   : > { %824 = vmatprep.subr.mxu1 %v467_v43 }
  0xee   : > { %825 = vmatpush3.msra.mxu1 %v467_v43 }
  0xef   : > { %826 = vmatprep.subr.mxu1 %v466_v45 }
  0xf0   : > { %827 = vmatpush3.msra.mxu1 %v466_v45 }
  0xf1   : > { %828 = vmatprep.subr.mxu1 %v465_v47 }
  0xf2   : > { %829 = vmatpush3.msra.mxu1 %v465_v47 }
  0xf3   : > { %830 = vmatprep.subr.mxu1 %v464_v51 }
  0xf4   : > { %831 = vmatpush3.msra.mxu1 %v464_v51 }
  0xf5   : > { %832 = vmatprep.subr.mxu1 %v463_v53 }
  0xf6   : > { %833 = vmatpush3.msra.mxu1 %v463_v53 }
  0xf7   : > { %834 = vmatprep.subr.mxu1 %v462_v54 }
  0xf8   : > { %835 = vmatpush3.msra.mxu1 %v462_v54 }
  0xf9   : > { %836 = vmatprep.subr.mxu1 %v461_v55 }
  0xfa   : > { %837 = vmatpush3.msra.mxu1 %v461_v55 }
  0xfb   : > { %839 = vmatmul.mubr.msk.f32.vlgmr.msra.gmra.mxu1 %vm497_vm1, %v470_v56 }
  0xfc   : > { %841 = vmatprep.mubr.msk.f32.mxu1 %vm497_vm1, %v471_v57 }
  0xff   : > { %842 = vmatmul.mubr.msk.f32.gmra.mxu1 %vm497_vm1, %v472_v58 }
 0x1bb   : > { %v840_v61 = vpop.f32.mrf.mxu1 }
 0x1bc   : > { %v582_v4 = vadd.f32 %v840_v61, %v485_v2 }
 0x1bd   : > { %v576_v63 = vpop.f32.mrf.mxu1 }
 0x1be   : > { %v577_v8 = vadd.f32 %v576_v63, %v480_v7  ;;  %v596_v10 = vmax.f32 %v582_v4, 0.0 }
 0x1bf   : > { %v843_v0 = vpop.f32.mrf.mxu1 }
 0x1c0   : > { %v592_v1 = vadd.f32 %v843_v0, %v495_v60  ;;  %v595_v11 = vmax.f32 %v577_v8, 0.0 }
 0x1c1   : > { %v586_v3 = vpop.f32.mrf.mxu1 }
 0x1c2   : > { %v598_v5 = vmax.f32 %v592_v1, 0.0  ;;  %v587_v6 = vadd.f32 %v586_v3, %v490_v62 }
 0x1c4   : > { %v597_v9 = vmax.f32 %v587_v6, 0.0  ;;  %845 = vmatpush3.msra.mxu0 %v598_v5 }
 0x1c5   : > { %846 = vmatprep.subr.mxu0 %v966_v59 }
 0x1c6   : > { %847 = vmatpush3.msra.mxu0 %v597_v9 }
 0x1c7   : > { %848 = vmatprep.subr.mxu0 %v966_v59 }
 0x1c8   : > { %849 = vmatpush3.msra.mxu0 %v596_v10 }
 0x1c9   : > { %850 = vmatprep.subr.mxu0 %v966_v59 }
 0x1ca   : > { %851 = vmatpush3.msra.mxu0 %v595_v11 }
 0x1cb   : > { %853 = vmatmul.mubr.msk.f32.vlgmr.msra.gmra.mxu0 %vm606_vm3, %v599_v12 }
 0x28b   : > { %v676_v14 = vpop.f32.mrf.mxu0 }
 0x28c   : > { %v677_v15 = vadd.f32 %v676_v14, %v604_v13 }
 0x28d   : > { %v854_v16 = vpop.f32.mrf.mxu0 }
 0x28e   : > { %v680_v17 = vsub.f32 0.0, %v677_v15 }
 0x290   : > { %v681_v18 = vmul.f32 1.442695, %v680_v17 }
 0x292   : > { %899 = vpow2.f32 %v681_v18 }
 0x29f   : > { %v900_v19 = vpop.eup %899 }
 0x2a0   : > { %v683_v20 = vadd.f32 1.0, %v900_v19 }
 0x2a2   : > { %901 = vrcp.f32 %v683_v20 }
 0x2af   : > { %v902_v21 = vpop.eup %901 }
 0x2b0   : > { %685 = vst [vmem:[%s269_s17] sm:$0xff] %v902_v21 }
 0x2b1   : > { %916 = shalt.err (!%p913_p3)
}
 0x2b2   : > { %s917_s9 = scalar_lea.hbm %s1157_s21, 128  ;;  %s921_s16 = scalar_lea.hbm %s1199_s7, 256 }
 0x2b3   : > { %p918_p4 = scmp.ne.s32.totalorder %s1157_s21, %s917_s9  ;;  %p922_p9 = scmp.lt.s32.totalorder %s1157_s21, %s1199_s7 }
 0x2b4   : > { %p923_p10 = scmp.lt.s32.totalorder %s921_s16, %s917_s9 }
 0x2b5   : > { %p919_p7 = pnand %p918_p4, %p1047_p5 }
 0x2b6   : > { %p924_p11 = por %p923_p10, %p922_p9 }
 0x2b7   : > { %p920_p8 = pneg %p919_p7 }
 0x2b9   : > { %p925_p12 = pnand %p924_p11, %p920_p8 }
 0x2bb   : > { %928 = shalt.err (!%p925_p12)
}
 0x2bc   : > { %855 = dma.vmem_to_hbm [thread:$0]  (%p1047_p5), %s701_s18, 128, %s1157_s21, %s687_s22  }
 0x2bd PF: > { %p861_p13 = scmp.ge.s32.totalorder %s963_s27, 2  ;;  %s712_s19 = sand.u32 1, %s951_s24  }
 0x2be   : > { %s713_s20 = scalar_lea.sflag [#allocation3], %s712_s19 }
 0x2bf   : > { %p858_p0 = pnand %p861_p13, %p1051_p6 }
 0x2c1   : > { %p859_p1 = pneg %p858_p0 }
 0x2c3   : > { %946 = dma.done.wait (%p859_p1), %s713_s20, 128  }
 0x2c4   : > { %948 = vsyncadd (%p859_p1), %s713_s20, 4294967168  ;;  %p17_p2 = scmp.ge.s32.totalorder %s1034_s30, 4   ;;  %s1202_s24 = smov %s955_s25 }
 0x2c5   : > { %s1203_s25 = smov %s959_s26  ;;  %s1204_s26 = smov %s1045_s10 }
 0x2c6   : > { %s1205_s27 = smov %s1034_s30  ;;  %19 = sbr.rel (!%p17_p2) target bundleno = 3 (0x3), region = 83 }
 0x2cb   :  { %718 = vsyncpa [#allocation3], 1 }
 0x2cc   :  { %720 = vsyncpa [#allocation3 + $0x1], 1 }

</bundles_post_ra>
